<compile_context>
chip_gen: v6e
topology: v6e:2x2x1
jax: 0.10.0
libtpu: 0.0.40
codegen_flags: <defaults>
</compile_context>

<pallas_src>
import functools

import jax
import jax.numpy as jnp
from jax import lax
from jax.experimental import pallas as pl
from jax.experimental.pallas import tpu as pltpu

_SLAB_WIDTH = 128   # one lane-tile wide; everything here fits in 128 lanes


# ----------------------------------------------------------------------------
# Pallas kernel
# ----------------------------------------------------------------------------
def _attn_rcnn_kernel(patches_ref, slab_ref, out_ref, *, T, B, H, C, WE2):
    """patches_ref: (T*B, WE2) f32, row block i = [patch(t=i) | patch(t=T-1-i)]
       slab_ref:    (rows, 128) packed weights/biases (see make_slab)
       out_ref:     (B, 1) f32
    """
    GI = 6 * H                      # gate lanes
    r_hh = WE2                      # first row of the fused hh weight
    r_bias = WE2 + 2 * H            # bias rows start here

    # ---- one-time carves from the packed slab (all off the serial chain) ----
    w_mega = slab_ref[0:r_hh, :]                     # (2*W*E, 128) conv+gi weight
    w_hh = slab_ref[r_hh:r_bias, :]                  # (2H, 128) block-diag fused W_hh^T
    bias_row = slab_ref[r_bias:r_bias + 1, :]        # (1, 128) gate (+folded hh r/z) + conv bias
    bhn_row = slab_ref[r_bias + 1:r_bias + 2, :]     # (1, 128) n-gate hh biases
    fc_row = slab_ref[r_bias + 2:r_bias + 3, :]      # (1, 128) fc weight row + fc bias

    bhn = bhn_row[:, 0:2 * H]                        # (1, 2H)   [b_hn_f | b_hn_b]
    fcw_rnn = fc_row[:, 0:2 * H]                     # (1, 2H)
    fcw_val = fc_row[:, 2 * H:2 * H + C]             # (1, C)
    fcb = fc_row[:, 2 * H + C:2 * H + C + 1]         # (1, 1)

    # ---- ONE fused matmul: Conv1d + input-gate projections, both dirs -------
    big = jnp.dot(patches_ref[...], w_mega,
                  preferred_element_type=jnp.float32) + bias_row       # (T*B, 128)
    # lanes [0:6H)    gate pre-projections [r_f|r_b|z_f|z_b|n_f|n_b]
    #                 (row block i: fwd gates for t=i, bwd gates for t=T-1-i)
    # lanes [6H:6H+C) Conv1d output at t=i (incl. conv bias)
    # lanes [6H+C:)   zero padding (ignored)

    # ---- residual branch: max over time (log2 tree over row blocks) ---------
    convp = big[:, GI:GI + C]                        # (T*B, C)
    m = convp
    n_rows = T * B
    while n_rows > B and n_rows % 2 == 0 and (n_rows // 2) % B == 0:
        half = n_rows // 2
        m = jnp.maximum(m[:half, :], m[half:, :])
        n_rows = half
    values = m[0:B, :]
    for t in range(1, n_rows // B):                  # remainder (none for pow-2 T)
        values = jnp.maximum(values, m[t * B:(t + 1) * B, :])

    # n-gate input projections, pre-sliced once off the recurrence chain
    gin_all = big[:, 4 * H:6 * H]                    # (T*B, 2H)

    # ---- fused, fully-unrolled bidirectional recurrence ----------------------
    h = jnp.zeros((B, 2 * H), jnp.float32)           # [h_f | h_b]
    acc = jnp.zeros((B, 2 * H), jnp.float32)         # running sum over time

    for i in range(T):
        rows_i = slice(i * B, (i + 1) * B)
        g = big[rows_i, :]                           # (B, 128)  whole-row slice
        gin = gin_all[rows_i, :]                     # (B, 2H)
        # ONE block-diagonal hh matmul: both directions, all gates.
        gh = jnp.dot(h, w_hh, preferred_element_type=jnp.float32)      # (B, 128)
        # ONE sigmoid: r & z of both directions live in lanes [0:4H);
        # the remaining lanes are harmless junk and never read.
        act = jax.nn.sigmoid(g + gh)
        r_cat = act[:, 0:2 * H]                      # [r_f | r_b]
        z_cat = act[:, 2 * H:4 * H]                  # [z_f | z_b]
        # ONE tanh (PyTorch n-gate: b_hn stays inside r * (W_hn h + b_hn)).
        n_cat = jnp.tanh(gin + r_cat * (gh[:, 4 * H:6 * H] + bhn))
        h = n_cat + z_cat * (h - n_cat)              # == (1-z)*n + z*h, both dirs
        acc = acc + h

    # ---- fc head: softmax over size-1 axis == 1 -> attention sum == time sum
    out = (jnp.sum(acc * fcw_rnn, axis=-1, keepdims=True)
           + jnp.sum(values * fcw_val, axis=-1, keepdims=True)
           + fcb)                                    # (B, 1)
    out_ref[...] = out


# ----------------------------------------------------------------------------
# One-time weight packing (hoisted out of the per-call path)
# ----------------------------------------------------------------------------
def make_slab(params):
    """Packs Conv1d, both GRU directions and the fc head into one (rows,128) slab.

    Row layout:
      [0 : 2*W*E)        W_mega : patches -> [gates (6H) | conv (C)]
      [2*W*E : +2H)      W_hh fused (block structured, h_cat -> gates)
      next row           bias_mega (gate biases w/ folded r/z hh bias, conv bias)
      next row           [b_hn_f | b_hn_b]
      next row           [fc_w (2H+C) | fc_b]
      padding to a multiple of 8 rows
    Gate lane order: [r_f | r_b | z_f | z_b | n_f | n_b].
    """
    assert params['attn_scale'].shape[-1] == 1, (
        "kernel exploits softmax over a size-1 trailing axis (scores (T,B,1)); "
        "attn_scale must have a single output column")

    conv_w = params['conv_w']                        # (C, E, W)
    C, E, W = conv_w.shape
    H = params['w_hh_f'].shape[1]
    WE = W * E
    GI = 6 * H
    width = _SLAB_WIDTH
    assert GI + C <= width and 2 * H + C + 1 <= width

    convw_flat = jnp.transpose(conv_w, (2, 1, 0)).reshape(WE, C)   # (W*E, C)
    cb = params['conv_b']                                          # (C,)

    def ih_block(w_ih, g):            # (C, H): conv channels -> gate g
        return w_ih[g * H:(g + 1) * H, :].T

    def hh_block(w_hh, g):            # (H, H): hidden -> gate g (h @ W^T)
        return w_hh[g * H:(g + 1) * H, :].T

    # column start per (gate g, direction d): interleaved [rf|rb|zf|zb|nf|nb]
    def col(g, d):
        return (2 * g + d) * H

    # ---- W_mega: folds Conv1d weight into the input-gate projections --------
    w_mega = jnp.zeros((2 * WE, width), jnp.float32)
    for d, w_ih in enumerate((params['w_ih_f'], params['w_ih_b'])):
        rows = slice(d * WE, (d + 1) * WE)           # fwd rows use patch(t), bwd rows patch(T-1-t)
        for g in range(3):
            w_mega = w_mega.at[rows, col(g, d):col(g, d) + H].set(
                convw_flat @ ih_block(w_ih, g))
    w_mega = w_mega.at[0:WE, GI:GI + C].set(convw_flat)   # conv output lanes (fwd time order)

    # ---- bias_mega: b_ih + conv_b@W_ih (+ folded r/z hh bias) + conv bias ---
    bias_mega = jnp.zeros((width,), jnp.float32)
    for d, (w_ih, b_ih, b_hh) in enumerate(
            ((params['w_ih_f'], params['b_ih_f'], params['b_hh_f']),
             (params['w_ih_b'], params['b_ih_b'], params['b_hh_b']))):
        for g in range(3):
            b = cb @ ih_block(w_ih, g) + b_ih[g * H:(g + 1) * H]
            if g < 2:                                 # r/z hh biases fold into gi
                b = b + b_hh[g * H:(g + 1) * H]
            bias_mega = bias_mega.at[col(g, d):col(g, d) + H].set(b)
    bias_mega = bias_mega.at[GI:GI + C].set(cb)

    # ---- fused block-structured W_hh: h_cat (2H) -> all six gate columns ----
    w_hh = jnp.zeros((2 * H, width), jnp.float32)
    for d, whh in enumerate((params['w_hh_f'], params['w_hh_b'])):
        rows = slice(d * H, (d + 1) * H)
        for g in range(3):
            w_hh = w_hh.at[rows, col(g, d):col(g, d) + H].set(hh_block(whh, g))

    # ---- n-gate hh biases (cannot be folded: sit inside r * (...)) ----------
    bhn_row = jnp.zeros((width,), jnp.float32)
    bhn_row = bhn_row.at[0:H].set(params['b_hh_f'][2 * H:3 * H])
    bhn_row = bhn_row.at[H:2 * H].set(params['b_hh_b'][2 * H:3 * H])

    # ---- fc head -------------------------------------------------------------
    fc_row = jnp.zeros((width,), jnp.float32)
    fc_row = fc_row.at[0:2 * H + C].set(params['fc_w'][0])
    fc_row = fc_row.at[2 * H + C].set(params['fc_b'][0])

    n_rows = 2 * WE + 2 * H + 3
    pad = (-n_rows) % 8
    slab = jnp.concatenate(
        [w_mega, w_hh,
         bias_mega.reshape(1, width),
         bhn_row.reshape(1, width),
         fc_row.reshape(1, width),
         jnp.zeros((pad, width), jnp.float32)], axis=0)
    return slab


# ----------------------------------------------------------------------------
# JAX wrapper (embedding gather + patch layout + pallas_call), jitted
# ----------------------------------------------------------------------------
def make_forward(window, hidden, out_channels, embed_dim):
    W, H, C = window, hidden, out_channels

    @jax.jit
    def forward(x_tokens, embed_table, slab):
        B, L = x_tokens.shape
        T = L // W
        # dropout(p=0.5) is identity in eval mode
        emb = jnp.take(embed_table, x_tokens, axis=0)            # (B, L, E)
        p = emb.reshape(B, T, W * embed_dim).transpose(1, 0, 2)  # (T, B, W*E)
        # row block i = [patch(t=i) | patch(t=T-1-i)]: the backward direction's
        # time reversal is pre-applied here so the kernel's recurrence reads one
        # contiguous (B, :) slice per step for BOTH GRU directions.
        p_step = jnp.concatenate([p, p[::-1]], axis=-1)          # (T, B, 2*W*E)
        patches = p_step.reshape(T * B, 2 * W * embed_dim).astype(jnp.float32)

        kernel = functools.partial(_attn_rcnn_kernel, T=T, B=B, H=H, C=C,
                                   WE2=2 * W * embed_dim)
        vmem = pl.BlockSpec(memory_space=pltpu.MemorySpace.VMEM)
        out = pl.pallas_call(
            kernel,
            out_shape=jax.ShapeDtypeStruct((B, 1), jnp.float32),
            in_specs=[vmem, vmem],
            out_specs=vmem,
        )(patches, slab)
        return out[:, 0]                                         # (B,)  == .squeeze(1)

    return forward


# Convenience one-shot API (prepares the slab on every call; prefer make_slab +
# make_forward when calling repeatedly).
def attention_rcnn_forward(x_tokens, params):
    C, E, W = params['conv_w'].shape
    H = params['w_hh_f'].shape[1]
    fwd = make_forward(W, H, C, E)
    return fwd(x_tokens, params['embed'].astype(jnp.float32), make_slab(params))


# ----------------------------------------------------------------------------
# Pure-JAX reference (mirrors the PyTorch forward in eval mode, including the
# attention/softmax branch, so the simplified kernel is validated against it)
# ----------------------------------------------------------------------------
def reference_forward(x_tokens, params):
    emb = params['embed'][x_tokens]          # (B, L, E)
    B, L, E = emb.shape
    conv_w = params['conv_w']
    C, _, W = conv_w.shape
    T = L // W
    H = params['w_hh_f'].shape[1]

    conv = jnp.einsum('btwe,cew->btc', emb.reshape(B, T, W, E), conv_w) \
        + params['conv_b']                   # (B, T, C)
    values = conv.max(axis=1)                # (B, C)
    x_seq = jnp.transpose(conv, (1, 0, 2))   # (T, B, C)

    def gru_dir(w_ih, w_hh, b_ih, b_hh, xs):
        def step(h, x):
            gi = x @ w_ih.T + b_ih
            gh = h @ w_hh.T + b_hh
            r = jax.nn.sigmoid(gi[:, :H] + gh[:, :H])
            z = jax.nn.sigmoid(gi[:, H:2 * H] + gh[:, H:2 * H])
            n = jnp.tanh(gi[:, 2 * H:] + r * gh[:, 2 * H:])
            h_new = (1.0 - z) * n + z * h
            return h_new, h_new
        h0 = jnp.zeros((B, H), jnp.float32)
        _, ys = lax.scan(step, h0, xs)
        return ys

    ys_f = gru_dir(params['w_ih_f'], params['w_hh_f'],
                   params['b_ih_f'], params['b_hh_f'], x_seq)
    ys_b = gru_dir(params['w_ih_b'], params['w_hh_b'],
                   params['b_ih_b'], params['b_hh_b'], x_seq[::-1])[::-1]
    rnn = jnp.concatenate([ys_f, ys_b], axis=-1)     # (T, B, 2H)

    g = rnn.mean(axis=0)                             # (B, 2H)
    attn = jnp.tanh(rnn @ params['wl'].T + params['bl'] + g @ params['wg'].T)
    scores = attn @ params['attn_scale']             # (T, B, 1)
    alpha = jax.nn.softmax(scores, axis=-1)          # == 1 (size-1 axis)
    fc_in = jnp.concatenate([(alpha * rnn).sum(axis=0), values], axis=-1)
    out = fc_in @ params['fc_w'].T + params['fc_b']
    return out[:, 0]


# ----------------------------------------------------------------------------
def make_params(key, embed_dim, out_channels, window, hidden, attn_size):
    ks = jax.random.split(key, 16)
    n = iter(range(16))
    s = 0.2
    p = {
        'embed': jax.random.normal(ks[next(n)], (257, embed_dim), jnp.float32) * s,
        'conv_w': jax.random.normal(ks[next(n)], (out_channels, embed_dim, window), jnp.float32) * s,
        'conv_b': jax.random.normal(ks[next(n)], (out_channels,), jnp.float32) * s,
        'w_ih_f': jax.random.normal(ks[next(n)], (3 * hidden, out_channels), jnp.float32) * s,
        'w_hh_f': jax.random.normal(ks[next(n)], (3 * hidden, hidden), jnp.float32) * s,
        'b_ih_f': jax.random.normal(ks[next(n)], (3 * hidden,), jnp.float32) * s,
        'b_hh_f': jax.random.normal(ks[next(n)], (3 * hidden,), jnp.float32) * s,
        'w_ih_b': jax.random.normal(ks[next(n)], (3 * hidden, out_channels), jnp.float32) * s,
        'w_hh_b': jax.random.normal(ks[next(n)], (3 * hidden, hidden), jnp.float32) * s,
        'b_ih_b': jax.random.normal(ks[next(n)], (3 * hidden,), jnp.float32) * s,
        'b_hh_b': jax.random.normal(ks[next(n)], (3 * hidden,), jnp.float32) * s,
        'wl': jax.random.normal(ks[next(n)], (attn_size, 2 * hidden), jnp.float32) * s,
        'bl': jax.random.normal(ks[next(n)], (attn_size,), jnp.float32) * s,
        'wg': jax.random.normal(ks[next(n)], (attn_size, 2 * hidden), jnp.float32) * s,
        'attn_scale': jax.random.normal(ks[next(n)], (attn_size, 1), jnp.float32) * s,
        'fc_w': jax.random.normal(ks[next(n)], (1, 2 * hidden + out_channels), jnp.float32) * s,
    }
    p['fc_b'] = jnp.array([0.1], jnp.float32)
    return p


if __name__ == "__main__":
    # config: embed_dim=8, out_channels=16, window=4, GRU, hidden=16,
    #         num_layers=1, bidirectional=True, attn_size=8, residual=True
    B, L = 2, 32
    embed_dim, out_channels, window, hidden, attn_size = 8, 16, 4, 16, 8

    key = jax.random.PRNGKey(0)
    k_x, k_p = jax.random.split(key)
    x = jax.random.randint(k_x, (B, L), 0, 257, dtype=jnp.int32)
    params = make_params(k_p, embed_dim, out_channels, window, hidden, attn_size)

    # one-time weight packing (hoisted out of the per-call path), jitted forward
    slab = make_slab(params)
    embed_table = params['embed'].astype(jnp.float32)
    forward = make_forward(window, hidden, out_channels, embed_dim)

    out = jax.block_until_ready(forward(x, embed_table, slab))

    ref = jax.block_until_ready(reference_forward(x, params))
    assert out.shape == (B,), out.shape
    assert jnp.allclose(out, ref, rtol=1e-4, atol=1e-4), (out, ref)
    print("KERNEL_OK")
</pallas_src>

<mosaic_0001>
module attributes {stable_mosaic.version = 11 : i64} {
  func.func @_attn_rcnn_kernel(%arg0: memref<16x64xf32, #tpu.memory_space<vmem>>, %arg1: memref<104x128xf32, #tpu.memory_space<vmem>>, %arg2: memref<2x1xf32, #tpu.memory_space<vmem>>) attributes {dimension_semantics = [], scalar_prefetch = 0 : i64, scratch_operands = 0 : i64, tpu.core_type = #tpu.core_type<tc>} {
    %c0 = arith.constant 0 : index
    %c0_0 = arith.constant 0 : index
    %0 = vector.load %arg1[%c0, %c0_0] : memref<104x128xf32, #tpu.memory_space<vmem>>, vector<64x128xf32>
    %c64 = arith.constant 64 : index
    %c0_1 = arith.constant 0 : index
    %1 = vector.load %arg1[%c64, %c0_1] : memref<104x128xf32, #tpu.memory_space<vmem>>, vector<32x128xf32>
    %c96 = arith.constant 96 : index
    %c0_2 = arith.constant 0 : index
    %2 = vector.load %arg1[%c96, %c0_2] : memref<104x128xf32, #tpu.memory_space<vmem>>, vector<1x128xf32>
    %c97 = arith.constant 97 : index
    %c0_3 = arith.constant 0 : index
    %3 = vector.load %arg1[%c97, %c0_3] : memref<104x128xf32, #tpu.memory_space<vmem>>, vector<1x128xf32>
    %c98 = arith.constant 98 : index
    %c0_4 = arith.constant 0 : index
    %4 = vector.load %arg1[%c98, %c0_4] : memref<104x128xf32, #tpu.memory_space<vmem>>, vector<1x128xf32>
    %5 = vector.extract_strided_slice %3 {offsets = [0, 0], sizes = [1, 32], strides = [1, 1]} : vector<1x128xf32> to vector<1x32xf32>
    %6 = vector.extract_strided_slice %4 {offsets = [0, 0], sizes = [1, 32], strides = [1, 1]} : vector<1x128xf32> to vector<1x32xf32>
    %7 = vector.extract_strided_slice %4 {offsets = [0, 32], sizes = [1, 16], strides = [1, 1]} : vector<1x128xf32> to vector<1x16xf32>
    %8 = vector.extract_strided_slice %4 {offsets = [0, 48], sizes = [1, 1], strides = [1, 1]} : vector<1x128xf32> to vector<1x1xf32>
    %c0_5 = arith.constant 0 : index
    %c0_6 = arith.constant 0 : index
    %9 = vector.load %arg0[%c0_5, %c0_6] : memref<16x64xf32, #tpu.memory_space<vmem>>, vector<16x64xf32>
    %cst = arith.constant dense<0.000000e+00> : vector<16x128xf32>
    %10 = tpu.matmul %9, %0, %cst {dimension_numbers = #tpu.dot_dimension_numbers<[1], [0], [0], [1], [0, 0, 1, 1], [], []>} : vector<16x64xf32>, vector<64x128xf32>, vector<16x128xf32> -> vector<16x128xf32>
    %11 = vector.broadcast %2 : vector<1x128xf32> to vector<16x128xf32>
    %12 = arith.addf %10, %11 : vector<16x128xf32>
    %13 = vector.extract_strided_slice %12 {offsets = [0, 96], sizes = [16, 16], strides = [1, 1]} : vector<16x128xf32> to vector<16x16xf32>
    %14 = vector.extract_strided_slice %13 {offsets = [0, 0], sizes = [8, 16], strides = [1, 1]} : vector<16x16xf32> to vector<8x16xf32>
    %15 = vector.extract_strided_slice %13 {offsets = [8, 0], sizes = [8, 16], strides = [1, 1]} : vector<16x16xf32> to vector<8x16xf32>
    %16 = arith.maximumf %14, %15 : vector<8x16xf32>
    %17 = vector.extract_strided_slice %16 {offsets = [0, 0], sizes = [4, 16], strides = [1, 1]} : vector<8x16xf32> to vector<4x16xf32>
    %18 = vector.extract_strided_slice %16 {offsets = [4, 0], sizes = [4, 16], strides = [1, 1]} : vector<8x16xf32> to vector<4x16xf32>
    %19 = arith.maximumf %17, %18 : vector<4x16xf32>
    %20 = vector.extract_strided_slice %19 {offsets = [0, 0], sizes = [2, 16], strides = [1, 1]} : vector<4x16xf32> to vector<2x16xf32>
    %21 = vector.extract_strided_slice %19 {offsets = [2, 0], sizes = [2, 16], strides = [1, 1]} : vector<4x16xf32> to vector<2x16xf32>
    %22 = arith.maximumf %20, %21 : vector<2x16xf32>
    %23 = vector.extract_strided_slice %12 {offsets = [0, 64], sizes = [16, 32], strides = [1, 1]} : vector<16x128xf32> to vector<16x32xf32>
    %cst_7 = arith.constant 0.000000e+00 : f32
    %24 = vector.broadcast %cst_7 : f32 to vector<2x32xf32>
    %cst_8 = arith.constant 0.000000e+00 : f32
    %25 = vector.broadcast %cst_8 : f32 to vector<2x32xf32>
    %26 = vector.extract_strided_slice %12 {offsets = [0, 0], sizes = [2, 128], strides = [1, 1]} : vector<16x128xf32> to vector<2x128xf32>
    %27 = vector.extract_strided_slice %23 {offsets = [0, 0], sizes = [2, 32], strides = [1, 1]} : vector<16x32xf32> to vector<2x32xf32>
    %cst_9 = arith.constant dense<0.000000e+00> : vector<2x128xf32>
    %28 = tpu.matmul %24, %1, %cst_9 {dimension_numbers = #tpu.dot_dimension_numbers<[1], [0], [0], [1], [0, 0, 1, 1], [], []>} : vector<2x32xf32>, vector<32x128xf32>, vector<2x128xf32> -> vector<2x128xf32>
    %29 = arith.addf %26, %28 : vector<2x128xf32>
    %30 = arith.negf %29 : vector<2x128xf32>
    %31 = math.exp %30 : vector<2x128xf32>
    %cst_10 = arith.constant 1.000000e+00 : f32
    %32 = vector.broadcast %cst_10 : f32 to vector<2x128xf32>
    %33 = arith.addf %32, %31 : vector<2x128xf32>
    %34 = arith.divf %32, %33 : vector<2x128xf32>
    %35 = vector.extract_strided_slice %34 {offsets = [0, 0], sizes = [2, 32], strides = [1, 1]} : vector<2x128xf32> to vector<2x32xf32>
    %36 = vector.extract_strided_slice %34 {offsets = [0, 32], sizes = [2, 32], strides = [1, 1]} : vector<2x128xf32> to vector<2x32xf32>
    %37 = vector.extract_strided_slice %28 {offsets = [0, 64], sizes = [2, 32], strides = [1, 1]} : vector<2x128xf32> to vector<2x32xf32>
    %38 = vector.broadcast %5 : vector<1x32xf32> to vector<2x32xf32>
    %39 = arith.addf %37, %38 : vector<2x32xf32>
    %40 = arith.mulf %35, %39 : vector<2x32xf32>
    %41 = arith.addf %27, %40 : vector<2x32xf32>
    %42 = math.tanh %41 : vector<2x32xf32>
    %43 = arith.subf %24, %42 : vector<2x32xf32>
    %44 = arith.mulf %36, %43 : vector<2x32xf32>
    %45 = arith.addf %42, %44 : vector<2x32xf32>
    %46 = arith.addf %25, %45 : vector<2x32xf32>
    %47 = vector.extract_strided_slice %12 {offsets = [2, 0], sizes = [2, 128], strides = [1, 1]} : vector<16x128xf32> to vector<2x128xf32>
    %48 = vector.extract_strided_slice %23 {offsets = [2, 0], sizes = [2, 32], strides = [1, 1]} : vector<16x32xf32> to vector<2x32xf32>
    %cst_11 = arith.constant dense<0.000000e+00> : vector<2x128xf32>
    %49 = tpu.matmul %45, %1, %cst_11 {dimension_numbers = #tpu.dot_dimension_numbers<[1], [0], [0], [1], [0, 0, 1, 1], [], []>} : vector<2x32xf32>, vector<32x128xf32>, vector<2x128xf32> -> vector<2x128xf32>
    %50 = arith.addf %47, %49 : vector<2x128xf32>
    %51 = arith.negf %50 : vector<2x128xf32>
    %52 = math.exp %51 : vector<2x128xf32>
    %cst_12 = arith.constant 1.000000e+00 : f32
    %53 = vector.broadcast %cst_12 : f32 to vector<2x128xf32>
    %54 = arith.addf %53, %52 : vector<2x128xf32>
    %55 = arith.divf %53, %54 : vector<2x128xf32>
    %56 = vector.extract_strided_slice %55 {offsets = [0, 0], sizes = [2, 32], strides = [1, 1]} : vector<2x128xf32> to vector<2x32xf32>
    %57 = vector.extract_strided_slice %55 {offsets = [0, 32], sizes = [2, 32], strides = [1, 1]} : vector<2x128xf32> to vector<2x32xf32>
    %58 = vector.extract_strided_slice %49 {offsets = [0, 64], sizes = [2, 32], strides = [1, 1]} : vector<2x128xf32> to vector<2x32xf32>
    %59 = vector.broadcast %5 : vector<1x32xf32> to vector<2x32xf32>
    %60 = arith.addf %58, %59 : vector<2x32xf32>
    %61 = arith.mulf %56, %60 : vector<2x32xf32>
    %62 = arith.addf %48, %61 : vector<2x32xf32>
    %63 = math.tanh %62 : vector<2x32xf32>
    %64 = arith.subf %45, %63 : vector<2x32xf32>
    %65 = arith.mulf %57, %64 : vector<2x32xf32>
    %66 = arith.addf %63, %65 : vector<2x32xf32>
    %67 = arith.addf %46, %66 : vector<2x32xf32>
    %68 = vector.extract_strided_slice %12 {offsets = [4, 0], sizes = [2, 128], strides = [1, 1]} : vector<16x128xf32> to vector<2x128xf32>
    %69 = vector.extract_strided_slice %23 {offsets = [4, 0], sizes = [2, 32], strides = [1, 1]} : vector<16x32xf32> to vector<2x32xf32>
    %cst_13 = arith.constant dense<0.000000e+00> : vector<2x128xf32>
    %70 = tpu.matmul %66, %1, %cst_13 {dimension_numbers = #tpu.dot_dimension_numbers<[1], [0], [0], [1], [0, 0, 1, 1], [], []>} : vector<2x32xf32>, vector<32x128xf32>, vector<2x128xf32> -> vector<2x128xf32>
    %71 = arith.addf %68, %70 : vector<2x128xf32>
    %72 = arith.negf %71 : vector<2x128xf32>
    %73 = math.exp %72 : vector<2x128xf32>
    %cst_14 = arith.constant 1.000000e+00 : f32
    %74 = vector.broadcast %cst_14 : f32 to vector<2x128xf32>
    %75 = arith.addf %74, %73 : vector<2x128xf32>
    %76 = arith.divf %74, %75 : vector<2x128xf32>
    %77 = vector.extract_strided_slice %76 {offsets = [0, 0], sizes = [2, 32], strides = [1, 1]} : vector<2x128xf32> to vector<2x32xf32>
    %78 = vector.extract_strided_slice %76 {offsets = [0, 32], sizes = [2, 32], strides = [1, 1]} : vector<2x128xf32> to vector<2x32xf32>
    %79 = vector.extract_strided_slice %70 {offsets = [0, 64], sizes = [2, 32], strides = [1, 1]} : vector<2x128xf32> to vector<2x32xf32>
    %80 = vector.broadcast %5 : vector<1x32xf32> to vector<2x32xf32>
    %81 = arith.addf %79, %80 : vector<2x32xf32>
    %82 = arith.mulf %77, %81 : vector<2x32xf32>
    %83 = arith.addf %69, %82 : vector<2x32xf32>
    %84 = math.tanh %83 : vector<2x32xf32>
    %85 = arith.subf %66, %84 : vector<2x32xf32>
    %86 = arith.mulf %78, %85 : vector<2x32xf32>
    %87 = arith.addf %84, %86 : vector<2x32xf32>
    %88 = arith.addf %67, %87 : vector<2x32xf32>
    %89 = vector.extract_strided_slice %12 {offsets = [6, 0], sizes = [2, 128], strides = [1, 1]} : vector<16x128xf32> to vector<2x128xf32>
    %90 = vector.extract_strided_slice %23 {offsets = [6, 0], sizes = [2, 32], strides = [1, 1]} : vector<16x32xf32> to vector<2x32xf32>
    %cst_15 = arith.constant dense<0.000000e+00> : vector<2x128xf32>
    %91 = tpu.matmul %87, %1, %cst_15 {dimension_numbers = #tpu.dot_dimension_numbers<[1], [0], [0], [1], [0, 0, 1, 1], [], []>} : vector<2x32xf32>, vector<32x128xf32>, vector<2x128xf32> -> vector<2x128xf32>
    %92 = arith.addf %89, %91 : vector<2x128xf32>
    %93 = arith.negf %92 : vector<2x128xf32>
    %94 = math.exp %93 : vector<2x128xf32>
    %cst_16 = arith.constant 1.000000e+00 : f32
    %95 = vector.broadcast %cst_16 : f32 to vector<2x128xf32>
    %96 = arith.addf %95, %94 : vector<2x128xf32>
    %97 = arith.divf %95, %96 : vector<2x128xf32>
    %98 = vector.extract_strided_slice %97 {offsets = [0, 0], sizes = [2, 32], strides = [1, 1]} : vector<2x128xf32> to vector<2x32xf32>
    %99 = vector.extract_strided_slice %97 {offsets = [0, 32], sizes = [2, 32], strides = [1, 1]} : vector<2x128xf32> to vector<2x32xf32>
    %100 = vector.extract_strided_slice %91 {offsets = [0, 64], sizes = [2, 32], strides = [1, 1]} : vector<2x128xf32> to vector<2x32xf32>
    %101 = vector.broadcast %5 : vector<1x32xf32> to vector<2x32xf32>
    %102 = arith.addf %100, %101 : vector<2x32xf32>
    %103 = arith.mulf %98, %102 : vector<2x32xf32>
    %104 = arith.addf %90, %103 : vector<2x32xf32>
    %105 = math.tanh %104 : vector<2x32xf32>
    %106 = arith.subf %87, %105 : vector<2x32xf32>
    %107 = arith.mulf %99, %106 : vector<2x32xf32>
    %108 = arith.addf %105, %107 : vector<2x32xf32>
    %109 = arith.addf %88, %108 : vector<2x32xf32>
    %110 = vector.extract_strided_slice %12 {offsets = [8, 0], sizes = [2, 128], strides = [1, 1]} : vector<16x128xf32> to vector<2x128xf32>
    %111 = vector.extract_strided_slice %23 {offsets = [8, 0], sizes = [2, 32], strides = [1, 1]} : vector<16x32xf32> to vector<2x32xf32>
    %cst_17 = arith.constant dense<0.000000e+00> : vector<2x128xf32>
    %112 = tpu.matmul %108, %1, %cst_17 {dimension_numbers = #tpu.dot_dimension_numbers<[1], [0], [0], [1], [0, 0, 1, 1], [], []>} : vector<2x32xf32>, vector<32x128xf32>, vector<2x128xf32> -> vector<2x128xf32>
    %113 = arith.addf %110, %112 : vector<2x128xf32>
    %114 = arith.negf %113 : vector<2x128xf32>
    %115 = math.exp %114 : vector<2x128xf32>
    %cst_18 = arith.constant 1.000000e+00 : f32
    %116 = vector.broadcast %cst_18 : f32 to vector<2x128xf32>
    %117 = arith.addf %116, %115 : vector<2x128xf32>
    %118 = arith.divf %116, %117 : vector<2x128xf32>
    %119 = vector.extract_strided_slice %118 {offsets = [0, 0], sizes = [2, 32], strides = [1, 1]} : vector<2x128xf32> to vector<2x32xf32>
    %120 = vector.extract_strided_slice %118 {offsets = [0, 32], sizes = [2, 32], strides = [1, 1]} : vector<2x128xf32> to vector<2x32xf32>
    %121 = vector.extract_strided_slice %112 {offsets = [0, 64], sizes = [2, 32], strides = [1, 1]} : vector<2x128xf32> to vector<2x32xf32>
    %122 = vector.broadcast %5 : vector<1x32xf32> to vector<2x32xf32>
    %123 = arith.addf %121, %122 : vector<2x32xf32>
    %124 = arith.mulf %119, %123 : vector<2x32xf32>
    %125 = arith.addf %111, %124 : vector<2x32xf32>
    %126 = math.tanh %125 : vector<2x32xf32>
    %127 = arith.subf %108, %126 : vector<2x32xf32>
    %128 = arith.mulf %120, %127 : vector<2x32xf32>
    %129 = arith.addf %126, %128 : vector<2x32xf32>
    %130 = arith.addf %109, %129 : vector<2x32xf32>
    %131 = vector.extract_strided_slice %12 {offsets = [10, 0], sizes = [2, 128], strides = [1, 1]} : vector<16x128xf32> to vector<2x128xf32>
    %132 = vector.extract_strided_slice %23 {offsets = [10, 0], sizes = [2, 32], strides = [1, 1]} : vector<16x32xf32> to vector<2x32xf32>
    %cst_19 = arith.constant dense<0.000000e+00> : vector<2x128xf32>
    %133 = tpu.matmul %129, %1, %cst_19 {dimension_numbers = #tpu.dot_dimension_numbers<[1], [0], [0], [1], [0, 0, 1, 1], [], []>} : vector<2x32xf32>, vector<32x128xf32>, vector<2x128xf32> -> vector<2x128xf32>
    %134 = arith.addf %131, %133 : vector<2x128xf32>
    %135 = arith.negf %134 : vector<2x128xf32>
    %136 = math.exp %135 : vector<2x128xf32>
    %cst_20 = arith.constant 1.000000e+00 : f32
    %137 = vector.broadcast %cst_20 : f32 to vector<2x128xf32>
    %138 = arith.addf %137, %136 : vector<2x128xf32>
    %139 = arith.divf %137, %138 : vector<2x128xf32>
    %140 = vector.extract_strided_slice %139 {offsets = [0, 0], sizes = [2, 32], strides = [1, 1]} : vector<2x128xf32> to vector<2x32xf32>
    %141 = vector.extract_strided_slice %139 {offsets = [0, 32], sizes = [2, 32], strides = [1, 1]} : vector<2x128xf32> to vector<2x32xf32>
    %142 = vector.extract_strided_slice %133 {offsets = [0, 64], sizes = [2, 32], strides = [1, 1]} : vector<2x128xf32> to vector<2x32xf32>
    %143 = vector.broadcast %5 : vector<1x32xf32> to vector<2x32xf32>
    %144 = arith.addf %142, %143 : vector<2x32xf32>
    %145 = arith.mulf %140, %144 : vector<2x32xf32>
    %146 = arith.addf %132, %145 : vector<2x32xf32>
    %147 = math.tanh %146 : vector<2x32xf32>
    %148 = arith.subf %129, %147 : vector<2x32xf32>
    %149 = arith.mulf %141, %148 : vector<2x32xf32>
    %150 = arith.addf %147, %149 : vector<2x32xf32>
    %151 = arith.addf %130, %150 : vector<2x32xf32>
    %152 = vector.extract_strided_slice %12 {offsets = [12, 0], sizes = [2, 128], strides = [1, 1]} : vector<16x128xf32> to vector<2x128xf32>
    %153 = vector.extract_strided_slice %23 {offsets = [12, 0], sizes = [2, 32], strides = [1, 1]} : vector<16x32xf32> to vector<2x32xf32>
    %cst_21 = arith.constant dense<0.000000e+00> : vector<2x128xf32>
    %154 = tpu.matmul %150, %1, %cst_21 {dimension_numbers = #tpu.dot_dimension_numbers<[1], [0], [0], [1], [0, 0, 1, 1], [], []>} : vector<2x32xf32>, vector<32x128xf32>, vector<2x128xf32> -> vector<2x128xf32>
    %155 = arith.addf %152, %154 : vector<2x128xf32>
    %156 = arith.negf %155 : vector<2x128xf32>
    %157 = math.exp %156 : vector<2x128xf32>
    %cst_22 = arith.constant 1.000000e+00 : f32
    %158 = vector.broadcast %cst_22 : f32 to vector<2x128xf32>
    %159 = arith.addf %158, %157 : vector<2x128xf32>
    %160 = arith.divf %158, %159 : vector<2x128xf32>
    %161 = vector.extract_strided_slice %160 {offsets = [0, 0], sizes = [2, 32], strides = [1, 1]} : vector<2x128xf32> to vector<2x32xf32>
    %162 = vector.extract_strided_slice %160 {offsets = [0, 32], sizes = [2, 32], strides = [1, 1]} : vector<2x128xf32> to vector<2x32xf32>
    %163 = vector.extract_strided_slice %154 {offsets = [0, 64], sizes = [2, 32], strides = [1, 1]} : vector<2x128xf32> to vector<2x32xf32>
    %164 = vector.broadcast %5 : vector<1x32xf32> to vector<2x32xf32>
    %165 = arith.addf %163, %164 : vector<2x32xf32>
    %166 = arith.mulf %161, %165 : vector<2x32xf32>
    %167 = arith.addf %153, %166 : vector<2x32xf32>
    %168 = math.tanh %167 : vector<2x32xf32>
    %169 = arith.subf %150, %168 : vector<2x32xf32>
    %170 = arith.mulf %162, %169 : vector<2x32xf32>
    %171 = arith.addf %168, %170 : vector<2x32xf32>
    %172 = arith.addf %151, %171 : vector<2x32xf32>
    %173 = vector.extract_strided_slice %12 {offsets = [14, 0], sizes = [2, 128], strides = [1, 1]} : vector<16x128xf32> to vector<2x128xf32>
    %174 = vector.extract_strided_slice %23 {offsets = [14, 0], sizes = [2, 32], strides = [1, 1]} : vector<16x32xf32> to vector<2x32xf32>
    %cst_23 = arith.constant dense<0.000000e+00> : vector<2x128xf32>
    %175 = tpu.matmul %171, %1, %cst_23 {dimension_numbers = #tpu.dot_dimension_numbers<[1], [0], [0], [1], [0, 0, 1, 1], [], []>} : vector<2x32xf32>, vector<32x128xf32>, vector<2x128xf32> -> vector<2x128xf32>
    %176 = arith.addf %173, %175 : vector<2x128xf32>
    %177 = arith.negf %176 : vector<2x128xf32>
    %178 = math.exp %177 : vector<2x128xf32>
    %cst_24 = arith.constant 1.000000e+00 : f32
    %179 = vector.broadcast %cst_24 : f32 to vector<2x128xf32>
    %180 = arith.addf %179, %178 : vector<2x128xf32>
    %181 = arith.divf %179, %180 : vector<2x128xf32>
    %182 = vector.extract_strided_slice %181 {offsets = [0, 0], sizes = [2, 32], strides = [1, 1]} : vector<2x128xf32> to vector<2x32xf32>
    %183 = vector.extract_strided_slice %181 {offsets = [0, 32], sizes = [2, 32], strides = [1, 1]} : vector<2x128xf32> to vector<2x32xf32>
    %184 = vector.extract_strided_slice %175 {offsets = [0, 64], sizes = [2, 32], strides = [1, 1]} : vector<2x128xf32> to vector<2x32xf32>
    %185 = vector.broadcast %5 : vector<1x32xf32> to vector<2x32xf32>
    %186 = arith.addf %184, %185 : vector<2x32xf32>
    %187 = arith.mulf %182, %186 : vector<2x32xf32>
    %188 = arith.addf %174, %187 : vector<2x32xf32>
    %189 = math.tanh %188 : vector<2x32xf32>
    %190 = arith.subf %171, %189 : vector<2x32xf32>
    %191 = arith.mulf %183, %190 : vector<2x32xf32>
    %192 = arith.addf %189, %191 : vector<2x32xf32>
    %193 = arith.addf %172, %192 : vector<2x32xf32>
    %194 = vector.broadcast %6 : vector<1x32xf32> to vector<2x32xf32>
    %195 = arith.mulf %193, %194 : vector<2x32xf32>
    %cst_25 = arith.constant dense<0.000000e+00> : vector<2xf32>
    %196 = vector.multi_reduction <add>, %195, %cst_25 [1] : vector<2x32xf32> to vector<2xf32>
    %197 = vector.shape_cast %196 : vector<2xf32> to vector<2x1xf32>
    %198 = vector.broadcast %7 : vector<1x16xf32> to vector<2x16xf32>
    %199 = arith.mulf %22, %198 : vector<2x16xf32>
    %cst_26 = arith.constant dense<0.000000e+00> : vector<2xf32>
    %200 = vector.multi_reduction <add>, %199, %cst_26 [1] : vector<2x16xf32> to vector<2xf32>
    %201 = vector.shape_cast %200 : vector<2xf32> to vector<2x1xf32>
    %202 = arith.addf %197, %201 : vector<2x1xf32>
    %203 = vector.broadcast %8 : vector<1x1xf32> to vector<2x1xf32>
    %204 = arith.addf %202, %203 : vector<2x1xf32>
    %c0_27 = arith.constant 0 : index
    %c0_28 = arith.constant 0 : index
    %205 = vector.load %arg2[%c0_27, %c0_28] : memref<2x1xf32, #tpu.memory_space<vmem>>, vector<2x1xf32>
    tpu.vector_store %arg2[%c0_27, %c0_28], %204 {strides = array<i32>} : memref<2x1xf32, #tpu.memory_space<vmem>>, vector<2x1xf32>,
    return
  }
}

</mosaic_0001>

<bundles_post_ra>
// kernel: forward.1
= control target key start
LH: loop header
LB: loop body
LE: loop exit
PB: predicated region body
PF: predicated region fallthrough
CT: control target
= control target key end

     0   :  { %v1312_v0 = vmov 0.0   ;;  %vm1313_vm0 = vmmov 0   ;;  %vm32_vm1 = vcmask 523264   ;;  %s1314_s7 = smov 64   ;;  %s1315_s13 = smov 96   ;;  %vm123_vm2 = vcmask 261120   ;;  %s1568_s1 = inlined_call_operand.vmem [shape: f32[104,128], index: 1, kind: input, shape index: {}]   ;;  %s1569_s0 = inlined_call_operand.vmem [shape: f32[16,64], index: 0, kind: input, shape index: {}]   ;;  %s1570_s2 = inlined_call_operand.vmem [shape: f32[2,1], index: 2, kind: output, shape index: {}]  }
   0x1   :  { %1170 = vmatprep.subr.mxu1 %v1312_v0  ;;  %v18_v1 = vld [vmem:[%s1568_s1 + $0x38] sm:$0xff]  ;;  %v17_v3 = vld [vmem:[%s1568_s1 + $0x30] sm:$0xff]  ;;  %1178 = vmatprep.mubr.msk.f32.mxu1 %vm1313_vm0, %v1312_v0  ;;  %v16_v5 = vld [vmem:[%s1568_s1 + $0x28] sm:$0xff]  ;;  %s1316_s14 = smov 32   ;;  %vm1065_vm3 = vcmask 123904   ;;  %vm1056_vm4 = vcmask 254976  }
   0x2   :  { %v1340_v2 = vld [vmem:[%s1568_s1 + $0x58] sm:$0xff]  ;;  %1151 = vmatprep.subr.mxu0 %v18_v1  ;;  %v1351_v4 = vld [vmem:[%s1568_s1 + $0x50] sm:$0xff]  ;;  %v1360_v6 = vld [vmem:[%s1568_s1 + $0x48] sm:$0xff]  ;;  %vm1075_vm5 = vcmask 1024  }
   0x3   :  { %1171 = vmatpush3.msra.mxu1 %v1340_v2  ;;  %1152 = vmatpush3.msra.mxu0 %v18_v1  ;;  %v15_v7 = vld [vmem:[%s1568_s1 + $0x20] sm:$0xff]  ;;  %v14_v9 = vld [vmem:[%s1568_s1 + $0x18] sm:$0xff]  ;;  %v13_v12 = vld [vmem:[%s1568_s1 + $0x10] sm:$0xff] }
   0x4   :  { %1172 = vmatprep.subr.mxu1 %v1312_v0  ;;  %1153 = vmatprep.subr.mxu0 %v17_v3  ;;  %v1370_v8 = vld [vmem:[%s1568_s1 + $0x40] sm:$0xff]  ;;  %v12_v13 = vld [vmem:[%s1568_s1 + $0x8] sm:$0xff] }
   0x5   :  { %1173 = vmatpush3.msra.mxu1 %v1351_v4  ;;  %1154 = vmatpush3.msra.mxu0 %v17_v3  ;;  %v26_v10 = vld [vmem:[%s1569_s0] sm:$0xff]  ;;  %v27_v15 = vld [vmem:[%s1569_s0 + $0x8] sm:$0xff] }
   0x6   :  { %1174 = vmatprep.subr.mxu1 %v1312_v0  ;;  %1155 = vmatprep.subr.mxu0 %v16_v5  ;;  %v1085_v11 = vld [vmem:[%s1568_s1 + $0x61] ss:$0 sm:$0xff]  ;;  %v1081_v21 = vld [vmem:[%s1568_s1 + $0x60] ss:$0 sm:$0xff] }
   0x7   :  { %1175 = vmatpush3.msra.mxu1 %v1360_v6  ;;  %1156 = vmatpush3.msra.mxu0 %v16_v5  ;;  %v11_v14 = vld [vmem:[%s1568_s1] sm:$0xff] }
   0x8   :  { %1176 = vmatprep.subr.mxu1 %v1312_v0  ;;  %1157 = vmatprep.subr.mxu0 %v15_v7 }
   0x9   :  { %1177 = vmatpush3.msra.mxu1 %v1370_v8  ;;  %1158 = vmatpush3.msra.mxu0 %v15_v7 }
   0xa   :  { %1179 = vmatmul.mubr.f32.vlgmr.msra.gmra.mxu1 %v1312_v0  ;;  %1159 = vmatprep.subr.mxu0 %v14_v9 }
   0xb   :  { %1167 = vmatprep.mubr.msk.f32.mxu0 %vm32_vm1, %v26_v10  ;;  %1160 = vmatpush3.msra.mxu0 %v14_v9 }
   0xc   :  { %209 = vrot.lane.b32.xlu0 %v1085_v11, %s1314_s7  ;;  %1161 = vmatprep.subr.mxu0 %v13_v12 }
   0xd   :  { %1181 = vmatprep.subr.mxu1 %v1312_v0  ;;  %1162 = vmatpush3.msra.mxu0 %v13_v12 }
   0xe   :  { %1182 = vmatpush3.msra.mxu1 %v1340_v2  ;;  %1163 = vmatprep.subr.mxu0 %v12_v13 }
   0xf   :  { %1183 = vmatprep.subr.mxu1 %v1312_v0  ;;  %1164 = vmatpush3.msra.mxu0 %v12_v13 }
  0x10   :  { %1184 = vmatpush3.msra.mxu1 %v1351_v4  ;;  %1165 = vmatprep.subr.mxu0 %v11_v14 }
  0x11   :  { %1185 = vmatprep.subr.mxu1 %v1312_v0  ;;  %1166 = vmatpush3.msra.mxu0 %v11_v14 }
  0x12   :  { %1186 = vmatpush3.msra.mxu1 %v1360_v6  ;;  %1168 = vmatmul.mubr.msk.f32.vlgmr.msra.gmra.mxu0 %vm32_vm1, %v27_v15 }
  0x13   :  { %1187 = vmatprep.subr.mxu1 %v1312_v0  ;;  %1189 = vmatprep.mubr.msk.f32.mxu1 %vm1313_vm0, %v1312_v0 }
  0x14   :  { %1188 = vmatpush3.msra.mxu1 %v1370_v8  ;;  %1192 = vmatprep.subr.mxu0 %v1312_v0 }
  0x15   :  { %1200 = vmatprep.mubr.msk.f32.mxu0 %vm1313_vm0, %v1312_v0  ;;  %1193 = vmatpush3.msra.mxu0 %v1340_v2 }
  0x16   :  { %1203 = vmatprep.subr.mxu1 %v1312_v0  ;;  %1194 = vmatprep.subr.mxu0 %v1312_v0 }
  0x17   :  { %1195 = vmatpush3.msra.mxu0 %v1351_v4 }
  0x18   :  { %1196 = vmatprep.subr.mxu0 %v1312_v0 }
  0x19   :  { %1197 = vmatpush3.msra.mxu0 %v1360_v6 }
  0x1a   :  { %1198 = vmatprep.subr.mxu0 %v1312_v0 }
  0x1b   :  { %1199 = vmatpush3.msra.mxu0 %v1370_v8 }
  0x1c   :  { %1214 = vmatprep.subr.mxu0 %v1312_v0 }
  0x7e   :  { %v1422_v16 = vpop.permute.xlu0 %209 }
  0xca   :  { %v193_v17 = vpop.f32.mrf.mxu1 }
  0xcb   :  { %v212_v18 = vadd.f32 %v1422_v16, %v193_v17 }
  0xcc   :  { %v1180_v19 = vpop.f32.mrf.mxu1 }
  0xcd   :  { %214 = vrot.lane.b32.xlu0 %v212_v18, %s1314_s7 }
  0xd2   :  { %v1169_v20 = vpop.f32.mrf.mxu0 }
  0xd3   :  { %v1429_v22 = vadd.f32 %v1169_v20, %v1081_v21 }
  0xd4   :  { %v105_v23 = vpop.f32.mrf.mxu0 }
  0xd5   :  { %v1431_v24 = vadd.f32 %v1081_v21, %v105_v23 }
  0xd7   :  { %v197_v25 = vadd.f32 %v193_v17, %v1431_v24 }
  0xd9   :  { %v1084_v26 = vmul.f32 -1.442695, %v197_v25 }
  0xdb   :  { %1264 = vpow2.f32 %v1084_v26 }
  0xe8   :  { %v1265_v27 = vpop.eup %1264 }
  0xe9   :  { %v201_v28 = vadd.f32 1.0, %v1265_v27 }
  0xeb   :  { %1266 = vrcp.f32 %v201_v28 }
  0xf8   :  { %v1267_v29 = vpop.eup %1266 }
 0x13f   :  { %v215_v30 = vpop.permute.xlu0 %214 }
 0x140   :  { %v217_v31 = vmul.f32 %v1267_v29, %v215_v30 }
 0x142   :  { %219 = vrot.lane.b32.xlu1 %v217_v31, %s1314_s7 }
 0x1b4   :  { %v220_v32 = vpop.permute.xlu1 %219 }
 0x1b5   :  { %v222_v33 = vadd.f32 %v220_v32, %v1431_v24 }
 0x1b7   :  { %1268 = vtanh.f32 %v222_v33 }
 0x1c4   :  { %v1269_v34 = vpop.eup %1268 }
 0x1c5   :  { %v224_v35 = vsub.f32 0.0, %v1269_v34 }
 0x1c7   :  { %226 = vrot.lane.b32.xlu1 %v224_v35, %s1315_s13 }
 0x239   :  { %v227_v36 = vpop.permute.xlu1 %226 }
 0x23a   :  { %v229_v37 = vmul.f32 %v1267_v29, %v227_v36 }
 0x23c   :  { %231 = vrot.lane.b32.xlu0 %v229_v37, %s1316_s14 }
 0x2ae   :  { %v232_v38 = vpop.permute.xlu0 %231 }
 0x2af   :  { %v1438_v39 = vadd.f32 %v1269_v34, %v232_v38 }
 0x2b1   :  { %237 = vrot.lane.b32.xlu1 %v1438_v39, %s1314_s7 }
 0x323   :  { %v238_v40 = vpop.permute.xlu1 %237 }
 0x324   :  { %1190 = vmatmul.mubr.msk.f32.vlgmr.msra.gmra.mxu1 %vm123_vm2, %v238_v40 }
 0x325   :  { %1204 = vmatpush3.msra.mxu1 %v1340_v2  ;;  %1211 = vmatprep.mubr.msk.f32.mxu1 %vm1313_vm0, %v1312_v0 }
 0x326   :  { %1205 = vmatprep.subr.mxu1 %v1312_v0 }
 0x327   :  { %1206 = vmatpush3.msra.mxu1 %v1351_v4 }
 0x328   :  { %1207 = vmatprep.subr.mxu1 %v1312_v0 }
 0x329   :  { %1208 = vmatpush3.msra.mxu1 %v1360_v6 }
 0x32a   :  { %1209 = vmatprep.subr.mxu1 %v1312_v0 }
 0x32b   :  { %1210 = vmatpush3.msra.mxu1 %v1370_v8 }
 0x32c   :  { %1225 = vmatprep.subr.mxu1 %v1312_v0 }
 0x3e4   :  { %v307_v41 = vpop.f32.mrf.mxu1 }
 0x3e5   :  { %v321_v42 = vadd.f32 %v307_v41, %v1422_v16  ;;  %v312_v45 = vrot.slane %v307_v41, 6 }
 0x3e6   :  { %v1191_v43 = vpop.f32.mrf.mxu1 }
 0x3e7   :  { %v323_v44 = vrot.slane %v321_v42, 6  ;;  %v314_v46 = vadd.f32 %v312_v45, %v1431_v24 }
 0x3e9   :  { %324 = vrot.lane.b32.xlu0 %v323_v44, %s1314_s7  ;;  %v1087_v47 = vmul.f32 -1.442695, %v314_v46 }
 0x3eb   :  { %1270 = vpow2.f32 %v1087_v47 }
 0x3f8   :  { %v1271_v48 = vpop.eup %1270 }
 0x3f9   :  { %v318_v49 = vadd.f32 1.0, %v1271_v48 }
 0x3fb   :  { %1272 = vrcp.f32 %v318_v49 }
 0x408   :  { %v1273_v50 = vpop.eup %1272 }
 0x45b   :  { %v325_v51 = vpop.permute.xlu0 %324 }
 0x45c   :  { %v327_v52 = vmul.f32 %v1273_v50, %v325_v51 }
 0x45e   :  { %329 = vrot.lane.b32.xlu1 %v327_v52, %s1314_s7 }
 0x4d0   :  { %v330_v53 = vpop.permute.xlu1 %329 }
 0x4d1   :  { %v332_v54 = vadd.f32 %v330_v53, %v1431_v24 }
 0x4d3   :  { %1274 = vtanh.f32 %v332_v54 }
 0x4e0   :  { %v1275_v55 = vpop.eup %1274 }
 0x4e1   :  { %v335_v56 = vrot.slane %v1275_v55, 2 }
 0x4e3   :  { %v337_v57 = vsub.f32 %v1438_v39, %v335_v56 }
 0x4e5   :  { %v339_v58 = vrot.slane %v337_v57, 6 }
 0x4e7   :  { %340 = vrot.lane.b32.xlu0 %v339_v58, %s1315_s13 }
 0x559   :  { %v341_v59 = vpop.permute.xlu0 %340 }
 0x55a   :  { %v343_v60 = vmul.f32 %v1273_v50, %v341_v59 }
 0x55c   :  { %345 = vrot.lane.b32.xlu1 %v343_v60, %s1316_s14 }
 0x5ce   :  { %v346_v61 = vpop.permute.xlu1 %345 }
 0x5cf   :  { %v348_v62 = vadd.f32 %v1275_v55, %v346_v61 }
 0x5d1   :  { %v350_v63 = vrot.slane %v348_v62, 2 }
 0x5d3   :  { %353 = vrot.lane.b32.xlu0 %v350_v63, %s1314_s7  ;;  %v352_v31 = vadd.f32 %v350_v63, %v1438_v39 }
 0x645   :  { %v354_v1 = vpop.permute.xlu0 %353 }
 0x646   :  { %1201 = vmatmul.mubr.msk.f32.vlgmr.msra.gmra.mxu0 %vm123_vm2, %v354_v1 }
 0x647   :  { %1215 = vmatpush3.msra.mxu0 %v1340_v2  ;;  %1222 = vmatprep.mubr.msk.f32.mxu0 %vm1313_vm0, %v1312_v0 }
 0x648   :  { %1216 = vmatprep.subr.mxu0 %v1312_v0 }
 0x649   :  { %1217 = vmatpush3.msra.mxu0 %v1351_v4 }
 0x64a   :  { %1218 = vmatprep.subr.mxu0 %v1312_v0 }
 0x64b   :  { %1219 = vmatpush3.msra.mxu0 %v1360_v6 }
 0x64c   :  { %1220 = vmatprep.subr.mxu0 %v1312_v0 }
 0x64d   :  { %1221 = vmatpush3.msra.mxu0 %v1370_v8 }
 0x64e   :  { %1236 = vmatprep.subr.mxu0 %v1312_v0 }
 0x706   :  { %v423_v3 = vpop.f32.mrf.mxu0 }
 0x707   :  { %v437_v5 = vadd.f32 %v423_v3, %v1422_v16  ;;  %v428_v10 = vrot.slane %v423_v3, 4 }
 0x708   :  { %v1202_v7 = vpop.f32.mrf.mxu0 }
 0x709   :  { %v439_v9 = vrot.slane %v437_v5, 4  ;;  %v430_v11 = vadd.f32 %v428_v10, %v1431_v24 }
 0x70b   :  { %440 = vrot.lane.b32.xlu1 %v439_v9, %s1314_s7  ;;  %v1089_v12 = vmul.f32 -1.442695, %v430_v11 }
 0x70d   :  { %1276 = vpow2.f32 %v1089_v12 }
 0x71a   :  { %v1277_v13 = vpop.eup %1276 }
 0x71b   :  { %v434_v14 = vadd.f32 1.0, %v1277_v13 }
 0x71d   :  { %1278 = vrcp.f32 %v434_v14 }
 0x72a   :  { %v1279_v15 = vpop.eup %1278 }
 0x77d   :  { %v441_v17 = vpop.permute.xlu1 %440 }
 0x77e   :  { %v443_v18 = vmul.f32 %v1279_v15, %v441_v17 }
 0x780   :  { %445 = vrot.lane.b32.xlu0 %v443_v18, %s1314_s7 }
 0x7f2   :  { %v446_v19 = vpop.permute.xlu0 %445 }
 0x7f3   :  { %v448_v20 = vadd.f32 %v446_v19, %v1431_v24 }
 0x7f5   :  { %1280 = vtanh.f32 %v448_v20 }
 0x802   :  { %v1281_v21 = vpop.eup %1280 }
 0x803   :  { %v451_v23 = vrot.slane %v1281_v21, 2 }
 0x805   :  { %v453_v25 = vsub.f32 %v348_v62, %v451_v23 }
 0x807   :  { %v455_v26 = vrot.slane %v453_v25, 6 }
 0x809   :  { %456 = vrot.lane.b32.xlu1 %v455_v26, %s1315_s13 }
 0x87b   :  { %v457_v27 = vpop.permute.xlu1 %456 }
 0x87c   :  { %v459_v28 = vmul.f32 %v1279_v15, %v457_v27 }
 0x87e   :  { %461 = vrot.lane.b32.xlu0 %v459_v28, %s1316_s14 }
 0x8f0   :  { %v462_v29 = vpop.permute.xlu0 %461 }
 0x8f1   :  { %v464_v30 = vadd.f32 %v1281_v21, %v462_v29 }
 0x8f3   :  { %v466_v32 = vrot.slane %v464_v30, 4 }
 0x8f5   :  { %v468_v33 = vadd.f32 %v466_v32, %v352_v31  ;;  %469 = vrot.lane.b32.xlu1 %v466_v32, %s1314_s7 }
 0x967   :  { %v470_v34 = vpop.permute.xlu1 %469 }
 0x968   :  { %1212 = vmatmul.mubr.msk.f32.vlgmr.msra.gmra.mxu1 %vm123_vm2, %v470_v34 }
 0x969   :  { %1226 = vmatpush3.msra.mxu1 %v1340_v2  ;;  %1233 = vmatprep.mubr.msk.f32.mxu1 %vm1313_vm0, %v1312_v0 }
 0x96a   :  { %1227 = vmatprep.subr.mxu1 %v1312_v0 }
 0x96b   :  { %1228 = vmatpush3.msra.mxu1 %v1351_v4 }
 0x96c   :  { %1229 = vmatprep.subr.mxu1 %v1312_v0 }
 0x96d   :  { %1230 = vmatpush3.msra.mxu1 %v1360_v6 }
 0x96e   :  { %1231 = vmatprep.subr.mxu1 %v1312_v0 }
 0x96f   :  { %1232 = vmatpush3.msra.mxu1 %v1370_v8 }
 0x970   :  { %1247 = vmatprep.subr.mxu1 %v1312_v0 }
 0xa28   :  { %v539_v35 = vpop.f32.mrf.mxu1 }
 0xa29   :  { %v553_v36 = vadd.f32 %v539_v35, %v1422_v16  ;;  %v544_v39 = vrot.slane %v539_v35, 2 }
 0xa2a   :  { %v1213_v37 = vpop.f32.mrf.mxu1 }
 0xa2b   :  { %v555_v38 = vrot.slane %v553_v36, 2  ;;  %v546_v40 = vadd.f32 %v544_v39, %v1431_v24 }
 0xa2d   :  { %556 = vrot.lane.b32.xlu0 %v555_v38, %s1314_s7  ;;  %v1091_v41 = vmul.f32 -1.442695, %v546_v40 }
 0xa2f   :  { %1282 = vpow2.f32 %v1091_v41 }
 0xa3c   :  { %v1283_v42 = vpop.eup %1282 }
 0xa3d   :  { %v550_v43 = vadd.f32 1.0, %v1283_v42 }
 0xa3f   :  { %1284 = vrcp.f32 %v550_v43 }
 0xa4c   :  { %v1285_v44 = vpop.eup %1284 }
 0xa9f   :  { %v557_v45 = vpop.permute.xlu0 %556 }
 0xaa0   :  { %v559_v46 = vmul.f32 %v1285_v44, %v557_v45 }
 0xaa2   :  { %561 = vrot.lane.b32.xlu1 %v559_v46, %s1314_s7 }
 0xb14   :  { %v562_v47 = vpop.permute.xlu1 %561 }
 0xb15   :  { %v564_v48 = vadd.f32 %v562_v47, %v1431_v24 }
 0xb17   :  { %1286 = vtanh.f32 %v564_v48 }
 0xb24   :  { %v1287_v49 = vpop.eup %1286 }
 0xb25   :  { %v567_v50 = vrot.slane %v1287_v49, 2 }
 0xb27   :  { %v569_v51 = vsub.f32 %v464_v30, %v567_v50 }
 0xb29   :  { %v571_v52 = vrot.slane %v569_v51, 6 }
 0xb2b   :  { %572 = vrot.lane.b32.xlu0 %v571_v52, %s1315_s13 }
 0xb9d   :  { %v573_v53 = vpop.permute.xlu0 %572 }
 0xb9e   :  { %v575_v54 = vmul.f32 %v1285_v44, %v573_v53 }
 0xba0   :  { %577 = vrot.lane.b32.xlu1 %v575_v54, %s1316_s14 }
 0xc12   :  { %v578_v55 = vpop.permute.xlu1 %577 }
 0xc13   :  { %v580_v56 = vadd.f32 %v1287_v49, %v578_v55 }
 0xc15   :  { %v582_v57 = vrot.slane %v580_v56, 6 }
 0xc17   :  { %v1500_v58 = vadd.f32 %v582_v57, %v468_v33  ;;  %585 = vrot.lane.b32.xlu0 %v582_v57, %s1314_s7 }
 0xc89   :  { %v586_v59 = vpop.permute.xlu0 %585 }
 0xc8a   :  { %1223 = vmatmul.mubr.msk.f32.vlgmr.msra.gmra.mxu0 %vm123_vm2, %v586_v59 }
 0xc8b   :  { %1237 = vmatpush3.msra.mxu0 %v1340_v2  ;;  %1244 = vmatprep.mubr.msk.f32.mxu0 %vm1313_vm0, %v1312_v0 }
 0xc8c   :  { %1238 = vmatprep.subr.mxu0 %v1312_v0 }
 0xc8d   :  { %1239 = vmatpush3.msra.mxu0 %v1351_v4 }
 0xc8e   :  { %1240 = vmatprep.subr.mxu0 %v1312_v0 }
 0xc8f   :  { %1241 = vmatpush3.msra.mxu0 %v1360_v6 }
 0xc90   :  { %1242 = vmatprep.subr.mxu0 %v1312_v0 }
 0xc91   :  { %1243 = vmatpush3.msra.mxu0 %v1370_v8 }
 0xd4a   :  { %v655_v60 = vpop.f32.mrf.mxu0 }
 0xd4b   :  { %v666_v61 = vadd.f32 %v655_v60, %v1422_v16  ;;  %v659_v63 = vadd.f32 %v655_v60, %v1429_v22 }
 0xd4c   :  { %v1224_v62 = vpop.f32.mrf.mxu0 }
 0xd4d   :  { %668 = vrot.lane.b32.xlu1 %v666_v61, %s1314_s7  ;;  %v1093_v1 = vmul.f32 -1.442695, %v659_v63 }
 0xd4f   :  { %1288 = vpow2.f32 %v1093_v1 }
 0xd5c   :  { %v1289_v3 = vpop.eup %1288 }
 0xd5d   :  { %v663_v5 = vadd.f32 1.0, %v1289_v3 }
 0xd5f   :  { %1290 = vrcp.f32 %v663_v5 }
 0xd6c   :  { %v1291_v7 = vpop.eup %1290 }
 0xdbf   :  { %v669_v9 = vpop.permute.xlu1 %668 }
 0xdc0   :  { %v671_v10 = vmul.f32 %v1291_v7, %v669_v9 }
 0xdc2   :  { %673 = vrot.lane.b32.xlu0 %v671_v10, %s1314_s7 }
 0xe34   :  { %v674_v11 = vpop.permute.xlu0 %673 }
 0xe35   :  { %v676_v12 = vadd.f32 %v674_v11, %v1429_v22 }
 0xe37   :  { %1292 = vtanh.f32 %v676_v12 }
 0xe44   :  { %v1293_v13 = vpop.eup %1292 }
 0xe45   :  { %v679_v14 = vrot.slane %v1293_v13, 2 }
 0xe47   :  { %v681_v15 = vsub.f32 %v580_v56, %v679_v14 }
 0xe49   :  { %v683_v17 = vrot.slane %v681_v15, 6 }
 0xe4b   :  { %684 = vrot.lane.b32.xlu1 %v683_v17, %s1315_s13 }
 0xebd   :  { %v685_v18 = vpop.permute.xlu1 %684 }
 0xebe   :  { %v687_v19 = vmul.f32 %v1291_v7, %v685_v18 }
 0xec0   :  { %689 = vrot.lane.b32.xlu0 %v687_v19, %s1316_s14 }
 0xf32   :  { %v690_v20 = vpop.permute.xlu0 %689 }
 0xf33   :  { %v692_v21 = vadd.f32 %v1293_v13, %v690_v20 }
 0xf35   :  { %695 = vrot.lane.b32.xlu1 %v692_v21, %s1314_s7  ;;  %v693_v42 = vadd.f32 %v692_v21, %v1500_v58 }
 0xfa7   :  { %v696_v23 = vpop.permute.xlu1 %695 }
 0xfa8   :  { %1234 = vmatmul.mubr.msk.f32.vlgmr.msra.gmra.mxu1 %vm123_vm2, %v696_v23 }
 0xfa9   :  { %1248 = vmatpush3.msra.mxu1 %v1340_v2  ;;  %1255 = vmatprep.mubr.msk.f32.mxu1 %vm1313_vm0, %v1312_v0 }
 0xfaa   :  { %1249 = vmatprep.subr.mxu1 %v1312_v0 }
 0xfab   :  { %1250 = vmatpush3.msra.mxu1 %v1351_v4 }
 0xfac   :  { %1251 = vmatprep.subr.mxu1 %v1312_v0 }
 0xfad   :  { %1252 = vmatpush3.msra.mxu1 %v1360_v6 }
 0xfae   :  { %1253 = vmatprep.subr.mxu1 %v1312_v0 }
 0xfaf   :  { %1254 = vmatpush3.msra.mxu1 %v1370_v8 }
0x1068   :  { %v765_v25 = vpop.f32.mrf.mxu1 }
0x1069   :  { %v779_v26 = vadd.f32 %v765_v25, %v1422_v16  ;;  %v770_v28 = vrot.slane %v765_v25, 6 }
0x106a   :  { %v1235_v27 = vpop.f32.mrf.mxu1 }
0x106b   :  { %v781_v2 = vrot.slane %v779_v26, 6  ;;  %v772_v29 = vadd.f32 %v770_v28, %v1429_v22 }
0x106d   :  { %782 = vrot.lane.b32.xlu0 %v781_v2, %s1314_s7  ;;  %v1095_v30 = vmul.f32 -1.442695, %v772_v29 }
0x106f   :  { %1294 = vpow2.f32 %v1095_v30 }
0x107c   :  { %v1295_v4 = vpop.eup %1294 }
0x107d   :  { %v776_v31 = vadd.f32 1.0, %v1295_v4  ;;  %v1100_v4 = vld [vmem:[%s1568_s1 + $0x62] ss:$0 sm:$0xff]  ;;  %s1317_s1 = smov 80  }
0x107f   :  { %1296 = vrcp.f32 %v776_v31  ;;  %v114_v31 = vmax.f32 %v1431_v24, %v1429_v22 }
0x108c   :  { %v1297_v6 = vpop.eup %1296 }
0x10df   :  { %v783_v32 = vpop.permute.xlu0 %782 }
0x10e0   :  { %v785_v0 = vmul.f32 %v1297_v6, %v783_v32 }
0x10e2   :  { %787 = vrot.lane.b32.xlu1 %v785_v0, %s1314_s7 }
0x1154   :  { %v788_v8 = vpop.permute.xlu1 %787 }
0x1155   :  { %v790_v33 = vadd.f32 %v788_v8, %v1429_v22 }
0x1157   :  { %1298 = vtanh.f32 %v790_v33 }
0x1164   :  { %v1299_v34 = vpop.eup %1298 }
0x1165   :  { %v793_v35 = vrot.slane %v1299_v34, 2 }
0x1167   :  { %v795_v36 = vsub.f32 %v692_v21, %v793_v35 }
0x1169   :  { %v797_v37 = vrot.slane %v795_v36, 6 }
0x116b   :  { %798 = vrot.lane.b32.xlu0 %v797_v37, %s1315_s13 }
0x11dd   :  { %v799_v38 = vpop.permute.xlu0 %798 }
0x11de   :  { %v801_v39 = vmul.f32 %v1297_v6, %v799_v38  ;;  %v116_v6 = vrot.slane %v114_v31, 4 }
0x11e0   :  { %803 = vrot.lane.b32.xlu1 %v801_v39, %s1316_s14  ;;  %v118_v32 = vmax.f32 %v114_v31, %v116_v6 }
0x11e2   :  { %v120_v0 = vrot.slane %v118_v32, 2 }
0x1252   :  { %v804_v40 = vpop.permute.xlu1 %803 }
0x1253   :  { %v806_v41 = vadd.f32 %v1299_v34, %v804_v40  ;;  %v122_v34 = vmax.f32 %v118_v32, %v120_v0 }
0x1255   :  { %v808_v43 = vrot.slane %v806_v41, 2 }
0x1257   :  { %v810_v44 = vadd.f32 %v808_v43, %v693_v42  ;;  %811 = vrot.lane.b32.xlu0 %v808_v43, %s1314_s7 }
0x12c9   :  { %v812_v45 = vpop.permute.xlu0 %811 }
0x12ca   :  { %1245 = vmatmul.mubr.msk.f32.vlgmr.msra.gmra.mxu0 %vm123_vm2, %v812_v45 }
0x138a   :  { %v881_v46 = vpop.f32.mrf.mxu0 }
0x138b   :  { %v895_v47 = vadd.f32 %v881_v46, %v1422_v16  ;;  %v886_v50 = vrot.slane %v881_v46, 4 }
0x138c   :  { %v1246_v48 = vpop.f32.mrf.mxu0 }
0x138d   :  { %v897_v49 = vrot.slane %v895_v47, 4  ;;  %v888_v51 = vadd.f32 %v886_v50, %v1429_v22 }
0x138f   :  { %898 = vrot.lane.b32.xlu1 %v897_v49, %s1314_s7  ;;  %v1097_v52 = vmul.f32 -1.442695, %v888_v51 }
0x1391   :  { %1300 = vpow2.f32 %v1097_v52 }
0x139e   :  { %v1301_v53 = vpop.eup %1300 }
0x139f   :  { %v892_v54 = vadd.f32 1.0, %v1301_v53 }
0x13a1   :  { %1302 = vrcp.f32 %v892_v54 }
0x13ae   :  { %v1303_v55 = vpop.eup %1302 }
0x1401   :  { %v899_v56 = vpop.permute.xlu1 %898 }
0x1402   :  { %v901_v57 = vmul.f32 %v1303_v55, %v899_v56 }
0x1404   :  { %903 = vrot.lane.b32.xlu0 %v901_v57, %s1314_s7 }
0x1476   :  { %v904_v58 = vpop.permute.xlu0 %903 }
0x1477   :  { %v906_v59 = vadd.f32 %v904_v58, %v1429_v22 }
0x1479   :  { %1304 = vtanh.f32 %v906_v59 }
0x1486   :  { %v1305_v60 = vpop.eup %1304 }
0x1487   :  { %v909_v61 = vrot.slane %v1305_v60, 2 }
0x1489   :  { %v911_v62 = vsub.f32 %v806_v41, %v909_v61 }
0x148b   :  { %v913_v63 = vrot.slane %v911_v62, 6 }
0x148d   :  { %914 = vrot.lane.b32.xlu1 %v913_v63, %s1315_s13 }
0x14ff   :  { %v915_v1 = vpop.permute.xlu1 %914 }
0x1500   :  { %v917_v3 = vmul.f32 %v1303_v55, %v915_v1 }
0x1502   :  { %919 = vrot.lane.b32.xlu0 %v917_v3, %s1316_s14 }
0x1574   :  { %v920_v5 = vpop.permute.xlu0 %919 }
0x1575   :  { %v922_v7 = vadd.f32 %v1305_v60, %v920_v5 }
0x1577   :  { %v924_v9 = vrot.slane %v922_v7, 4 }
0x1579   :  { %v926_v10 = vadd.f32 %v924_v9, %v810_v44  ;;  %927 = vrot.lane.b32.xlu1 %v924_v9, %s1314_s7 }
0x15eb   :  { %v928_v11 = vpop.permute.xlu1 %927 }
0x15ec   :  { %1256 = vmatmul.mubr.msk.f32.vlgmr.msra.gmra.mxu1 %vm123_vm2, %v928_v11 }
0x16ac   :  { %v997_v12 = vpop.f32.mrf.mxu1 }
0x16ad   :  { %v1011_v13 = vadd.f32 %v997_v12, %v1422_v16  ;;  %v1002_v17 = vrot.slane %v997_v12, 2 }
0x16ae   :  { %v1257_v14 = vpop.f32.mrf.mxu1 }
0x16af   :  { %v1013_v15 = vrot.slane %v1011_v13, 2  ;;  %v1004_v18 = vadd.f32 %v1002_v17, %v1429_v22 }
0x16b1   :  { %1014 = vrot.lane.b32.xlu0 %v1013_v15, %s1314_s7  ;;  %v1099_v19 = vmul.f32 -1.442695, %v1004_v18 }
0x16b3   :  { %1306 = vpow2.f32 %v1099_v19 }
0x16c0   :  { %v1307_v20 = vpop.eup %1306 }
0x16c1   :  { %v1008_v21 = vadd.f32 1.0, %v1307_v20 }
0x16c3   :  { %1308 = vrcp.f32 %v1008_v21 }
0x16d0   :  { %v1309_v23 = vpop.eup %1308 }
0x1723   :  { %v1015_v25 = vpop.permute.xlu0 %1014 }
0x1724   :  { %v1017_v26 = vmul.f32 %v1309_v23, %v1015_v25 }
0x1726   :  { %1019 = vrot.lane.b32.xlu1 %v1017_v26, %s1314_s7 }
0x1798   :  { %v1020_v27 = vpop.permute.xlu1 %1019 }
0x1799   :  { %v1022_v16 = vadd.f32 %v1020_v27, %v1429_v22 }
0x179b   :  { %1310 = vtanh.f32 %v1022_v16 }
0x17a8   :  { %v1311_v2 = vpop.eup %1310 }
0x17a9   :  { %v1025_v28 = vrot.slane %v1311_v2, 2 }
0x17ab   :  { %v1027_v29 = vsub.f32 %v922_v7, %v1025_v28 }
0x17ad   :  { %v1029_v30 = vrot.slane %v1027_v29, 6 }
0x17af   :  { %1030 = vrot.lane.b32.xlu0 %v1029_v30, %s1315_s13 }
0x17b3   :  { %1048 = vrot.lane.b32.xlu0 %v1100_v4, %s1314_s7 }
0x1821   :  { %v1031_v8 = vpop.permute.xlu0 %1030 }
0x1822   :  { %v1033_v33 = vmul.f32 %v1309_v23, %v1031_v8 }
0x1824   :  { %1035 = vrot.lane.b32.xlu1 %v1033_v33, %s1316_s14 }
0x1825   :  { %v1049_v35 = vpop.permute.xlu0 %1048 }
0x1826   :  { %v1060_v36 = vmul.f32 %v1049_v35, %v122_v34 }
0x1828   :  { %1062 = vrot.lane.b32.xlu0 %v1060_v36, %s1316_s14 }
0x1896   :  { %v1036_v37 = vpop.permute.xlu1 %1035 }
0x1897   :  { %v1038_v38 = vadd.f32 %v1311_v2, %v1036_v37 }
0x1899   :  { %v1040_v39 = vrot.slane %v1038_v38, 6 }
0x189a   :  { %v1063_v40 = vpop.permute.xlu0 %1062 }
0x189b   :  { %v1042_v41 = vadd.f32 %v1040_v39, %v926_v10  ;;  %v1066_v42 = vsel %vm1065_vm3, %v1063_v40, 0.0 }
0x189c   :  { %1067 = vadd.xlane.f32.xlu0 %v1066_v42 }
0x189d   :  { %v1051_v22 = vmul.f32 %v1049_v35, %v1042_v41 }
0x189f   :  { %1053 = vrot.lane.b32.xlu1 %v1051_v22, %s1314_s7 }
0x1911   :  { %v1054_v24 = vpop.permute.xlu1 %1053 }
0x1912   :  { %v1057_v43 = vsel %vm1056_vm4, %v1054_v24, 0.0 }
0x1913   :  { %1058 = vadd.xlane.f32.xlu1 %v1057_v43 }
0x1925   :  { %v1068_v44 = vpop.xlane.xlu0 %1067 }
0x199c   :  { %v1059_v45 = vpop.xlane.xlu1 %1058 }
0x199d   :  { %v1069_v46 = vadd.f32 %v1068_v44, %v1059_v45 }
0x199f   :  { %v1070_v47 = vadd.f32 %v1100_v4, %v1069_v46 }
0x19a1   :  { %1072 = vrot.lane.b32.xlu0 %v1070_v47, %s1317_s1 }
0x1a13   :  { %v1073_v48 = vpop.permute.xlu0 %1072 }
0x1a14   :  { %1076 = vst.msk [vmem:[%s1570_s2] sm:$0x3] %vm1075_vm5, %v1073_v48 }

</bundles_post_ra>
